<compile_context>
chip_gen: v5e
topology: v5e:2x2
jax: 0.10.0
libtpu: 0.0.40
codegen_flags: <defaults>
</compile_context>

<pallas_src>
import jax
import jax.numpy as jnp
from jax.experimental import pallas as pl
from jax.experimental.pallas import tpu as pltpu


_MAX_TILE_B = 1024
_ROW_ALIGN = 32          # covers sublane packing for int8 / bf16 / f32 mask dtypes
_VMEM_BUDGET = 24 << 20  # per-call scoped-VMEM target (fits v5e/v6e/v7x with headroom)


def _round_up(x, m):
    return (x + m - 1) // m * m


def _plan_tiles(B, K, N, x_itemsize, mask_itemsize):
    """Pick a batch tile that balances tiles, fits the VMEM budget and keeps
    both v7x TensorCores busy; also return a vmem_limit_bytes to request."""
    # Double-buffered per-row streams (x in, mask in, logits out, lse out) + resident W/bias.
    per_row = 2 * (K * x_itemsize + N * mask_itemsize + N * 4 + 4)
    fixed = 2 * (K * N * 2 + N * 4)
    budget_rows = max((_VMEM_BUDGET - fixed) // max(per_row, 1), _ROW_ALIGN)
    max_tile = min(_MAX_TILE_B, max(_ROW_ALIGN, (budget_rows // _ROW_ALIGN) * _ROW_ALIGN))

    num_tiles = pl.cdiv(B, max_tile)
    if B > 2 * _ROW_ALIGN:
        # Give the v7x megacore (2 TCs) at least 2 parallel grid steps for mid-size batches.
        num_tiles = max(num_tiles, 2)
    tile_b = min(max_tile, _round_up(pl.cdiv(B, num_tiles), _ROW_ALIGN))
    if tile_b >= B:
        tile_b = B  # single full-extent block (always a legal block shape)

    vmem_limit = int(min(max(fixed + tile_b * per_row + (4 << 20), 32 << 20), 56 << 20))
    return tile_b, vmem_limit


def _categorical_masked_kernel(x_ref, w_ref, b_ref, avail_ref, logits_ref, lse_ref):
    # x_ref:      (TILE_B, K) f32    input features (batch tile, cast to bf16 on the VPU)
    # w_ref:      (K, N)      bf16   linear weight, already transposed (resident)
    # b_ref:      (1, N)      f32    bias (resident)
    # avail_ref:  (TILE_B, N) any    0 => unavailable
    # logits_ref: (TILE_B, N) f32    masked, unnormalized logits
    # lse_ref:    (TILE_B, 1) f32    logsumexp(masked logits) per row
    logits = jnp.dot(x_ref[...].astype(jnp.bfloat16), w_ref[...],
                     preferred_element_type=jnp.float32) + b_ref[...]
    logits = jnp.where(avail_ref[...] == 0, -1.0e10, logits)
    logits_ref[...] = logits
    # torch Categorical(logits=...) normalization constant (log_probs = logits - lse).
    # Assumes >= 1 available action per row (as does the PyTorch module).
    m = jnp.max(logits, axis=-1, keepdims=True)
    lse_ref[...] = m + jnp.log(jnp.sum(jnp.exp(logits - m), axis=-1, keepdims=True))


def _categorical_nomask_kernel(x_ref, w_ref, b_ref, logits_ref, lse_ref):
    logits = jnp.dot(x_ref[...].astype(jnp.bfloat16), w_ref[...],
                     preferred_element_type=jnp.float32) + b_ref[...]
    logits_ref[...] = logits
    m = jnp.max(logits, axis=-1, keepdims=True)
    lse_ref[...] = m + jnp.log(jnp.sum(jnp.exp(logits - m), axis=-1, keepdims=True))


def _common_call(kernel, x, w_kn, b_row, extra_in, mask_itemsize):
    B, K = x.shape
    N = w_kn.shape[1]
    tile_b, vmem_limit = _plan_tiles(B, K, N, x.dtype.itemsize, mask_itemsize)

    in_specs = [
        pl.BlockSpec((tile_b, K), lambda i: (i, 0)),   # x tile (f32, cast in-kernel)
        pl.BlockSpec((K, N), lambda i: (0, 0)),        # W (resident)
        pl.BlockSpec((1, N), lambda i: (0, 0)),        # bias (resident)
    ]
    args = [x, w_kn, b_row]
    if extra_in is not None:
        in_specs.append(pl.BlockSpec((tile_b, N), lambda i: (i, 0)))  # mask tile
        args.append(extra_in)

    cost = pl.CostEstimate(
        flops=2 * B * K * N,
        transcendentals=B * (N + 1),
        bytes_accessed=(B * K * x.dtype.itemsize + K * N * 2 + N * 4
                        + B * N * mask_itemsize + B * N * 4 + B * 4),
    )

    return pl.pallas_call(
        kernel,
        out_shape=(jax.ShapeDtypeStruct((B, N), jnp.float32),
                   jax.ShapeDtypeStruct((B, 1), jnp.float32)),
        grid=(pl.cdiv(B, tile_b),),
        in_specs=in_specs,
        out_specs=(pl.BlockSpec((tile_b, N), lambda i: (i, 0)),
                   pl.BlockSpec((tile_b, 1), lambda i: (i, 0))),
        compiler_params=pltpu.CompilerParams(
            dimension_semantics=("parallel",),
            vmem_limit_bytes=vmem_limit),
        cost_estimate=cost,
    )(*args)


@jax.jit
def categorical_forward_masked(x, w_kn, b_row, available_actions):
    """x: (B, K) f32; w_kn: (K, N) bf16; b_row: (1, N) f32;
    available_actions: (B, N), nonzero == available.
    Returns (masked logits (B, N) f32, logsumexp (B, 1) f32)."""
    return _common_call(_categorical_masked_kernel, x, w_kn, b_row,
                        available_actions, available_actions.dtype.itemsize)


@jax.jit
def categorical_forward_nomask(x, w_kn, b_row):
    return _common_call(_categorical_nomask_kernel, x, w_kn, b_row, None, 0)


class FixedCategoricalJax:
    """JAX analogue of FixedCategorical, built from masked logits + logsumexp."""

    def __init__(self, logits, lse):
        self.logits = logits      # (B, N) masked, unnormalized
        self._lse = lse           # (B, 1) logsumexp(logits)

    @property
    def probs(self):
        return jnp.exp(self.logits - self._lse)

    def mode(self):
        return jnp.argmax(self.logits, axis=-1, keepdims=True)

    def log_probs(self, actions):
        a = actions.squeeze(-1)
        lp = jnp.take_along_axis(self.logits, a[..., None], axis=-1)[..., 0]
        lp = lp - self._lse[..., 0]
        return lp.reshape(actions.shape[0], -1).sum(-1)[..., None]

    def sample(self, key):
        # TODO(synk): torch uses a stateful global RNG; JAX needs an explicit key.
        return jax.random.categorical(key, self.logits, axis=-1)[..., None]


class CategoricalPallas:
    """JAX/Pallas port of the HAPPO `Categorical` module."""

    def __init__(self, num_inputs, num_outputs, use_orthogonal=True, gain=0.01,
                 key=None):
        if key is None:
            key = jax.random.PRNGKey(0)
        if use_orthogonal:
            weight = jax.nn.initializers.orthogonal(scale=gain)(
                key, (num_outputs, num_inputs), jnp.float32)
        else:
            weight = jax.nn.initializers.glorot_uniform()(
                key, (num_outputs, num_inputs), jnp.float32) * gain
        self.weight = weight                              # (N, K), PyTorch layout
        self.bias = jnp.zeros((num_outputs,), jnp.float32)
        self.num_outputs = num_outputs

        # Kernel-ready parameters: transpose / cast ONCE (not per forward).
        self._w_kn = weight.T.astype(jnp.bfloat16)        # (K, N) bf16 for the MXU
        self._b_row = self.bias.reshape(1, num_outputs)   # (1, N) f32

    def __call__(self, x, available_actions=None):
        if available_actions is None:
            logits, lse = categorical_forward_nomask(x, self._w_kn, self._b_row)
        else:
            logits, lse = categorical_forward_masked(x, self._w_kn, self._b_row,
                                                     available_actions)
        return FixedCategoricalJax(logits, lse)


if __name__ == "__main__":
    key = jax.random.PRNGKey(0)
    k_x, k_w, k_m, k_s = jax.random.split(key, 4)

    batch, num_inputs, num_outputs = 8, 32, 16
    x = jax.random.normal(k_x, (batch, num_inputs), jnp.float32)
    # mask out a few actions (keep at least one available per row)
    avail = (jax.random.uniform(k_m, (batch, num_outputs)) > 0.3).astype(jnp.float32)
    avail = avail.at[:, 0].set(1.0)

    head = CategoricalPallas(num_inputs, num_outputs, use_orthogonal=True,
                             gain=0.01, key=k_w)

    # --- masked path ---
    dist = head(x, available_actions=avail)
    logits = jax.block_until_ready(dist.logits)
    lse = jax.block_until_ready(dist._lse)
    probs = jax.block_until_ready(dist.probs)

    # Reference with the same bf16 input cast / f32 accumulation as the kernel.
    ref_logits = jnp.dot(x.astype(jnp.bfloat16), head.weight.T.astype(jnp.bfloat16),
                         preferred_element_type=jnp.float32) + head.bias
    ref_logits = jnp.where(avail == 0, -1.0e10, ref_logits)
    ref_probs = jax.nn.softmax(ref_logits, axis=-1)
    ref_lse = jax.nn.logsumexp(ref_logits, axis=-1, keepdims=True)
    assert logits.shape == (batch, num_outputs) and lse.shape == (batch, 1)
    assert jnp.allclose(logits, ref_logits, atol=1e-4, rtol=1e-5)
    assert jnp.allclose(lse, ref_lse, atol=1e-4, rtol=1e-5)
    assert jnp.allclose(probs, ref_probs, atol=1e-5, rtol=1e-5)
    assert jnp.allclose(probs.sum(-1), 1.0, atol=1e-5)

    # Sanity vs. exact f32 linear (looser tol: bf16 input rounding only).
    f32_logits = jnp.where(avail == 0, -1.0e10, x @ head.weight.T + head.bias)
    assert jnp.allclose(logits, f32_logits, atol=5e-4, rtol=5e-2)

    mode = jax.block_until_ready(dist.mode())
    lp = jax.block_until_ready(dist.log_probs(mode))
    samp = jax.block_until_ready(dist.sample(k_s))
    assert mode.shape == (batch, 1) and lp.shape == (batch, 1) and samp.shape == (batch, 1)
    assert bool(jnp.all(avail[jnp.arange(batch), samp[:, 0]] != 0))

    # --- no-mask path (specialized kernel, no mask stream) ---
    dist_nm = head(x)
    logits_nm = jax.block_until_ready(dist_nm.logits)
    lse_nm = jax.block_until_ready(dist_nm._lse)
    ref_nm = jnp.dot(x.astype(jnp.bfloat16), head.weight.T.astype(jnp.bfloat16),
                     preferred_element_type=jnp.float32) + head.bias
    assert jnp.allclose(logits_nm, ref_nm, atol=1e-4, rtol=1e-5)
    assert jnp.allclose(lse_nm, jax.nn.logsumexp(ref_nm, axis=-1, keepdims=True),
                        atol=1e-4, rtol=1e-5)
    assert jnp.allclose(dist_nm.probs.sum(-1), 1.0, atol=1e-5)

    print("KERNEL_OK")
</pallas_src>

<mosaic_0001>
module attributes {stable_mosaic.version = 11 : i64} {
  func.func @_categorical_masked_kernel(%arg0: i32, %arg1: memref<8x32xf32, #tpu.memory_space<vmem>>, %arg2: memref<32x16xbf16, #tpu.memory_space<vmem>>, %arg3: memref<1x16xf32, #tpu.memory_space<vmem>>, %arg4: memref<8x16xf32, #tpu.memory_space<vmem>>, %arg5: memref<8x16xf32, #tpu.memory_space<vmem>>, %arg6: memref<8x1xf32, #tpu.memory_space<vmem>>) attributes {dimension_semantics = [#tpu.dimension_semantics<parallel>], iteration_bounds = array<i64: 1>, scalar_prefetch = 0 : i64, scratch_operands = 0 : i64, tpu.core_type = #tpu.core_type<tc>, window_params = [{transform_indices = @transform_0, window_bounds = array<i64: 8, 32>}, {pipeline_mode = #tpu.pipeline_mode<synchronous>, transform_indices = @transform_1, window_bounds = array<i64: 32, 16>}, {pipeline_mode = #tpu.pipeline_mode<synchronous>, transform_indices = @transform_2, window_bounds = array<i64: 1, 16>}, {transform_indices = @transform_3, window_bounds = array<i64: 8, 16>}, {transform_indices = @transform_4, window_bounds = array<i64: 8, 16>}, {transform_indices = @transform_5, window_bounds = array<i64: 8, 1>}]} {
    %c0 = arith.constant 0 : index
    %c0_0 = arith.constant 0 : index
    %0 = vector.load %arg1[%c0, %c0_0] : memref<8x32xf32, #tpu.memory_space<vmem>>, vector<8x32xf32>
    %1 = arith.truncf %0 : vector<8x32xf32> to vector<8x32xbf16>
    %c0_1 = arith.constant 0 : index
    %c0_2 = arith.constant 0 : index
    %2 = vector.load %arg2[%c0_1, %c0_2] : memref<32x16xbf16, #tpu.memory_space<vmem>>, vector<32x16xbf16>
    %cst = arith.constant dense<0.000000e+00> : vector<8x16xf32>
    %3 = tpu.matmul %1, %2, %cst {dimension_numbers = #tpu.dot_dimension_numbers<[1], [0], [0], [1], [0, 0, 1, 1], [], []>} : vector<8x32xbf16>, vector<32x16xbf16>, vector<8x16xf32> -> vector<8x16xf32>
    %c0_3 = arith.constant 0 : index
    %c0_4 = arith.constant 0 : index
    %4 = vector.load %arg3[%c0_3, %c0_4] : memref<1x16xf32, #tpu.memory_space<vmem>>, vector<1x16xf32>
    %5 = vector.broadcast %4 : vector<1x16xf32> to vector<8x16xf32>
    %6 = arith.addf %3, %5 : vector<8x16xf32>
    %c0_5 = arith.constant 0 : index
    %c0_6 = arith.constant 0 : index
    %7 = vector.load %arg4[%c0_5, %c0_6] : memref<8x16xf32, #tpu.memory_space<vmem>>, vector<8x16xf32>
    %cst_7 = arith.constant 0.000000e+00 : f32
    %8 = vector.broadcast %cst_7 : f32 to vector<8x16xf32>
    %9 = arith.cmpf oeq, %7, %8 : vector<8x16xf32>
    %cst_8 = arith.constant -1.000000e+10 : f32
    %10 = vector.broadcast %cst_8 : f32 to vector<8x16xf32>
    %11 = arith.select %9, %10, %6 : vector<8x16xi1>, vector<8x16xf32>
    %c0_9 = arith.constant 0 : index
    %c0_10 = arith.constant 0 : index
    %12 = vector.load %arg5[%c0_9, %c0_10] : memref<8x16xf32, #tpu.memory_space<vmem>>, vector<8x16xf32>
    tpu.vector_store %arg5[%c0_9, %c0_10], %11 {strides = array<i32>} : memref<8x16xf32, #tpu.memory_space<vmem>>, vector<8x16xf32>,
    %cst_11 = arith.constant dense<0xFF800000> : vector<8xf32>
    %13 = vector.multi_reduction <maximumf>, %11, %cst_11 [1] : vector<8x16xf32> to vector<8xf32>
    %14 = vector.shape_cast %13 : vector<8xf32> to vector<8x1xf32>
    %15 = vector.broadcast %14 : vector<8x1xf32> to vector<8x16xf32>
    %16 = arith.subf %11, %15 : vector<8x16xf32>
    %17 = math.exp %16 : vector<8x16xf32>
    %cst_12 = arith.constant dense<0.000000e+00> : vector<8xf32>
    %18 = vector.multi_reduction <add>, %17, %cst_12 [1] : vector<8x16xf32> to vector<8xf32>
    %19 = vector.shape_cast %18 : vector<8xf32> to vector<8x1xf32>
    %20 = math.log %19 : vector<8x1xf32>
    %21 = arith.addf %14, %20 : vector<8x1xf32>
    %c0_13 = arith.constant 0 : index
    %c0_14 = arith.constant 0 : index
    %22 = vector.load %arg6[%c0_13, %c0_14] : memref<8x1xf32, #tpu.memory_space<vmem>>, vector<8x1xf32>
    tpu.vector_store %arg6[%c0_13, %c0_14], %21 {strides = array<i32>} : memref<8x1xf32, #tpu.memory_space<vmem>>, vector<8x1xf32>,
    return
  }
  func.func @transform_0(%arg0: i32) -> (i32, i32) {
    %c0_i32 = arith.constant 0 : i32
    %c0_i32_0 = arith.constant 0 : i32
    return %arg0, %c0_i32 : i32, i32
  }
  func.func @transform_1(%arg0: i32) -> (i32, i32) {
    %c0_i32 = arith.constant 0 : i32
    %c0_i32_0 = arith.constant 0 : i32
    %c0_i32_1 = arith.constant 0 : i32
    return %c0_i32, %c0_i32_0 : i32, i32
  }
  func.func @transform_2(%arg0: i32) -> (i32, i32) {
    %c0_i32 = arith.constant 0 : i32
    %c0_i32_0 = arith.constant 0 : i32
    %c0_i32_1 = arith.constant 0 : i32
    return %c0_i32, %c0_i32_0 : i32, i32
  }
  func.func @transform_3(%arg0: i32) -> (i32, i32) {
    %c0_i32 = arith.constant 0 : i32
    %c0_i32_0 = arith.constant 0 : i32
    return %arg0, %c0_i32 : i32, i32
  }
  func.func @transform_4(%arg0: i32) -> (i32, i32) {
    %c0_i32 = arith.constant 0 : i32
    %c0_i32_0 = arith.constant 0 : i32
    return %arg0, %c0_i32 : i32, i32
  }
  func.func @transform_5(%arg0: i32) -> (i32, i32) {
    %c0_i32 = arith.constant 0 : i32
    %c0_i32_0 = arith.constant 0 : i32
    return %arg0, %c0_i32 : i32, i32
  }
}

</mosaic_0001>

<bundles_post_ra>
// kernel: categorical_forward_masked.1
= control target key start
LH: loop header
LB: loop body
LE: loop exit
PB: predicated region body
PF: predicated region fallthrough
CT: control target
= control target key end

     0   :  { %s197_s0 = inlined_call_operand.vmem [shape: f32[8,32], index: 0, kind: input, shape index: {}]   ;;  %s198_s1 = inlined_call_operand.vmem [shape: bf16[32,16], index: 1, kind: input, shape index: {}]   ;;  %s199_s2 = inlined_call_operand.vmem [shape: f32[1,16], index: 2, kind: input, shape index: {}]   ;;  %s200_s3 = inlined_call_operand.vmem [shape: f32[8,16], index: 3, kind: input, shape index: {}]   ;;  %s201_s4 = inlined_call_operand.hbm [shape: f32[8,16], index: 4, kind: output, shape index: {0}]   ;;  %s202_s5 = inlined_call_operand.vmem [shape: f32[8,1], index: 5, kind: output, shape index: {1}]  }
   0x1   :  { %v109_v0 = vld [vmem:[%s198_s1 + $0x8] sm:$0xff] }
   0x2   :  { %11 = vsyncpa [#allocation3], 0  ;;  %53 = vmatpush.bf16.msra.mxu0 %v109_v0  ;;  %v108_v1 = vld [vmem:[%s198_s1] sm:$0xff]  ;;  %vm43_vm0 = vcmask 261120   ;;  %vm63_vm2 = vcmask 130048   ;;  %vm77_vm3 = vcmask 7168  }
   0x3   :  { %v21_v2 = vld [vmem:[%s197_s0] sm:$0xff]  ;;  %s142_s0 = smov [#allocation2]  }
   0x4   :  { %v22_v3 = vpack.c.bf16 %v21_v2, %v21_v2  ;;  %v111_v4 = vld [vmem:[%s199_s2] ss:$0 sm:$0xff]  ;;  %s84_s1 = sshll.u32 %s142_s0, 4  ;;  %s85_s1 = int_to_ptr.vmem [resolvable:$true] %s84_s1 }
   0x5   :  { %v60_v5 = vld [vmem:[%s200_s3] sm:$0xff]  ;;  %s86_s3 = sshll.u32 %s201_s4, 4  ;;  %s87_s3 = int_to_ptr.hbm [resolvable:$true] %s86_s3 }
   0x6   :  { %54 = vmatpush.bf16.msra.mxu0 %v108_v1  ;;  %vm61_vm1 = vcmp.eq.f32.partialorder %v60_v5, 0.0 }
   0x9   :  { %107 = vmatmul.msk.bf16.vlgmr.msra.gmra.mxu0 %vm43_vm0, %v22_v3 }
  0x86   :  { %v56_v6 = vpop.f32.mrf.mxu0 }
  0x87   :  { %v57_v7 = vadd.f32 %v111_v4, %v56_v6 }
  0x89   :  { %v62_v8 = vsel %vm61_vm1, -1e+10, %v57_v7 }
  0x8a   :  { %v65_v9 = vsel %vm63_vm2, %v62_v8, -inf  ;;  %64 = vst.msk [vmem:[#allocation2] sm:$0xff] %vm63_vm2, %v62_v8 }
  0x8b   :  { %66 = vmax.xlane.f32.xlu0 %v65_v9  ;;  %89 = dma.vmem_to_hbm [thread:$0]  %s85_s1, 128, %s87_s3, [#allocation3]  }
  0x8e   :  { %v58_v10 = vpop.f32.mrf.mxu0 }
  0xfe   :  { %v67_v11 = vpop.xlane.xlu0 %66 }
  0xff   :  { %v68_v12 = vsub.f32 %v62_v8, %v67_v11 }
 0x101   :  { %v69_v13 = vmul.f32 1.442695, %v68_v12 }
 0x103   :  { %112 = vpow2.f32 %v69_v13 }
 0x109   :  { %v113_v14 = vpop.eup %112 }
 0x10a   :  { %v71_v15 = vsel %vm63_vm2, %v113_v14, 0.0 }
 0x10b   :  { %72 = vadd.xlane.f32.xlu0 %v71_v15 }
 0x17e   :  { %v73_v16 = vpop.xlane.xlu0 %72 }
 0x17f   :  { %114 = vlog2.f32 %v73_v16 }
 0x185   :  { %v115_v17 = vpop.eup %114 }
 0x186   :  { %v75_v18 = vmul.f32 0.6931472, %v115_v17 }
 0x188   :  { %v76_v19 = vadd.f32 %v75_v18, %v67_v11 }
 0x18a   :  { %78 = vst.msk [vmem:[%s202_s5] sm:$0xff] %vm77_vm3, %v76_v19 }
 0x18b   :  { %140 = dma.done.wait [#allocation3], 128  }
 0x18c   :  { %141 = vsyncadd [#allocation3], 4294967168 }
 0x18d   :  { %98 = vsyncpa [#allocation3], 1 }

</bundles_post_ra>
